<compile_context>
chip_gen: v6e
topology: v6e:2x2x1
jax: 0.10.0
libtpu: 0.0.40
codegen_flags: <defaults>
</compile_context>

<pallas_src>
import jax
import jax.numpy as jnp
from jax.experimental import pallas as pl
from jax.experimental.pallas import tpu as pltpu


def _round_up(x, m):
    return ((x + m - 1) // m) * m


def _vmem_budget_bytes():
    """~75% of physical VMEM (never the full capacity), with a safe fallback."""
    try:
        cap = pltpu.get_tpu_info().vmem_capacity_bytes
        return int(cap) * 3 // 4
    except Exception:
        return 48 * 1024 * 1024   # safe on v5e / v6e / v7x


def _linear_kernel(x_ref, w_ref, b_ref, o_ref):
    # x_ref: [tm, tk], w_ref: [tk, tn] (pre-transposed [In, Out] layout),
    # b_ref: [1, tn], o_ref: [tm, tn] float32 (k-resident accumulator block).
    @pl.when(pl.program_id(2) == 0)
    def _():
        # Fold the bias into the accumulator init -> no separate epilogue pass.
        o_ref[...] = jnp.broadcast_to(b_ref[...], o_ref.shape)

    o_ref[...] += jnp.dot(x_ref[...], w_ref[...],
                          preferred_element_type=jnp.float32)


def prepare_linear_params(weight, bias, *, tk_cap=1024):
    """One-time (per model) preprocessing of nn.Linear parameters.

    weight: [Out, In] (PyTorch layout), bias: [Out].
    Transposes to [In, Out] and pads to a lane-dense [Kp, Np] slab so the
    per-call path never touches W/b again.
    """
    Out, In = weight.shape

    # Choose the K tile once, based on In: prefer no K padding at all.
    if In <= tk_cap:
        tk, Kp = In, In
    else:
        tk = next((t for t in (1024, 512, 256, 128) if In % t == 0), None)
        if tk is None:
            tk = 512
            Kp = _round_up(In, tk)
        else:
            Kp = In

    Np = _round_up(Out, 128)          # lane-dense output / weight columns

    w_t = jnp.asarray(weight).T       # [In, Out] -> plain [tk, tn] RHS tiles
    if (Kp, Np) != (In, Out):
        w_t = jnp.pad(w_t, ((0, Kp - In), (0, Np - Out)))
    b_p = jnp.asarray(bias)
    if Np != Out:
        b_p = jnp.pad(b_p, (0, Np - Out))
    b_p = b_p.reshape(1, Np)

    return {"w": w_t, "b": b_p, "In": In, "Out": Out,
            "tk": tk, "Kp": Kp, "Np": Np}


def linear_forward(x, params):
    """x: [B, In] -> [B, Out] float32, computing y = x @ W^T + b."""
    B, In = x.shape
    assert In == params["In"], "x feature dim must match weight"
    w, b = params["w"], params["b"]
    tk, Kp, Np, Out = params["tk"], params["Kp"], params["Np"], params["Out"]

    vmem_limit = _vmem_budget_bytes()
    # Tile caps: 512 floor everywhere; 1024 when the VMEM budget clearly
    # allows it (v5e/v6e report 128 MiB physical -> 96 MiB budget).
    tile_cap = 1024 if vmem_limit >= 80 * 1024 * 1024 else 512

    # M tile: avoid padding x whenever B fits a single tile (full-dim blocks
    # are legal even when B is not a multiple of 8).
    if B <= tile_cap:
        tm, Mp = B, B
    else:
        tm = tile_cap
        Mp = _round_up(B, tm)

    # N tile: Np is a multiple of 128 by construction.
    if Np <= tile_cap:
        tn = Np
    else:
        tn = next(t for t in (1024, 512, 256, 128) if t <= tile_cap and Np % t == 0)

    # Guarantee >= 2 parallel blocks when splittable so both v7x TensorCores
    # get work (cost elsewhere is negligible for such small grids).
    if (Mp // tm) * (Np // tn) == 1:
        if tm >= 16 and (tm // 2) % 8 == 0:
            tm //= 2
        elif tn % 256 == 0:
            tn //= 2

    xp = x
    if Mp != B or Kp != In:
        xp = jnp.pad(x, ((0, Mp - B), (0, Kp - In)))

    grid = (Mp // tm, Np // tn, Kp // tk)
    gm, gn, gk = grid

    bytes_accessed = int(
        Mp * Kp * xp.dtype.itemsize * gn          # x re-streamed once per N tile
        + Kp * Np * w.dtype.itemsize * gm         # W re-streamed once per M tile
        + Np * b.dtype.itemsize * gm * gn         # bias per output tile (tiny)
        + Mp * Np * 4                             # f32 output write
    )

    out_padded = pl.pallas_call(
        _linear_kernel,
        out_shape=jax.ShapeDtypeStruct((Mp, Np), jnp.float32),
        grid=grid,
        in_specs=[
            pl.BlockSpec((tm, tk), lambda i, j, k: (i, k)),   # x tile
            pl.BlockSpec((tk, tn), lambda i, j, k: (k, j)),   # W^T tile [In, Out]
            pl.BlockSpec((1, tn), lambda i, j, k: (0, j)),    # bias tile
        ],
        out_specs=pl.BlockSpec((tm, tn), lambda i, j, k: (i, j)),
        compiler_params=pltpu.CompilerParams(
            dimension_semantics=("parallel", "parallel", "arbitrary"),
            vmem_limit_bytes=vmem_limit,
        ),
        cost_estimate=pl.CostEstimate(
            flops=2 * Mp * Np * Kp,
            transcendentals=0,
            bytes_accessed=bytes_accessed,
        ),
    )(xp, w, b)

    if Mp == B and Np == Out:
        return out_padded
    return out_padded[:B, :Out]


if __name__ == "__main__":
    key = jax.random.PRNGKey(0)

    def make_case(k, batch, input_size, output_size):
        kx, kw, kb = jax.random.split(k, 3)
        bound = 1.0 / (input_size ** 0.5)
        weight = jax.random.uniform(
            kw, (output_size, input_size), jnp.float32, -bound, bound)
        bias = jax.random.uniform(kb, (output_size,), jnp.float32, -bound, bound)
        x = jax.random.normal(kx, (batch, input_size), jnp.float32)
        return x, weight, bias

    k1, k2, k3 = jax.random.split(key, 3)

    # Case 1: small shapes consistent with nn.Linear(input_size, output_size).
    x, weight, bias = make_case(k1, batch=8, input_size=32, output_size=16)
    params = prepare_linear_params(weight, bias)
    out = linear_forward(x, params)
    jax.block_until_ready(out)
    ref = x @ weight.T + bias
    assert out.shape == ref.shape
    assert jnp.allclose(out, ref, atol=1e-5, rtol=1e-5), "mismatch (small case)"

    # Case 2: multi-block parallel grid (M split to feed both TensorCores).
    x2, w2, b2 = make_case(k2, batch=256, input_size=384, output_size=256)
    p2 = prepare_linear_params(w2, b2)
    out2 = linear_forward(x2, p2)
    jax.block_until_ready(out2)
    ref2 = x2 @ w2.T + b2
    assert out2.shape == ref2.shape
    assert jnp.allclose(out2, ref2, atol=1e-4, rtol=1e-4), "mismatch (tiled case)"

    # Case 3: K-tiled accumulation path (In > tk cap -> grid_k > 1).
    x3, w3, b3 = make_case(k3, batch=64, input_size=2048, output_size=192)
    p3 = prepare_linear_params(w3, b3)
    out3 = linear_forward(x3, p3)
    jax.block_until_ready(out3)
    ref3 = x3 @ w3.T + b3
    assert out3.shape == ref3.shape
    assert jnp.allclose(out3, ref3, atol=1e-3, rtol=1e-3), "mismatch (k-tiled case)"

    print("KERNEL_OK")
</pallas_src>

<mosaic_0001>
module attributes {stable_mosaic.version = 11 : i64} {
  func.func @_linear_kernel(%arg0: i32, %arg1: i32, %arg2: i32, %arg3: memref<8x32xf32, #tpu.memory_space<vmem>>, %arg4: memref<32x128xf32, #tpu.memory_space<vmem>>, %arg5: memref<1x128xf32, #tpu.memory_space<vmem>>, %arg6: memref<8x128xf32, #tpu.memory_space<vmem>>) attributes {dimension_semantics = [#tpu.dimension_semantics<parallel>, #tpu.dimension_semantics<parallel>, #tpu.dimension_semantics<arbitrary>], iteration_bounds = array<i64: 1, 1, 1>, scalar_prefetch = 0 : i64, scratch_operands = 0 : i64, tpu.core_type = #tpu.core_type<tc>, window_params = [{transform_indices = @transform_0, window_bounds = array<i64: 8, 32>}, {transform_indices = @transform_1, window_bounds = array<i64: 32, 128>}, {transform_indices = @transform_2, window_bounds = array<i64: 1, 128>}, {transform_indices = @transform_3, window_bounds = array<i64: 8, 128>}]} {
    %c0_i32 = arith.constant 0 : i32
    %0 = arith.cmpi eq, %arg2, %c0_i32 : i32
    %1 = arith.extui %0 : i1 to i32
    %c0_i32_0 = arith.constant 0 : i32
    %2 = arith.cmpi ne, %1, %c0_i32_0 : i32
    scf.if %2 {
      %c0_8 = arith.constant 0 : index
      %c0_9 = arith.constant 0 : index
      %9 = vector.load %arg5[%c0_8, %c0_9] : memref<1x128xf32, #tpu.memory_space<vmem>>, vector<1x128xf32>
      %10 = vector.shape_cast %9 : vector<1x128xf32> to vector<1x128xf32>
      %11 = vector.broadcast %10 : vector<1x128xf32> to vector<8x128xf32>
      %c0_10 = arith.constant 0 : index
      %c0_11 = arith.constant 0 : index
      %12 = vector.load %arg6[%c0_10, %c0_11] : memref<8x128xf32, #tpu.memory_space<vmem>>, vector<8x128xf32>
      tpu.vector_store %arg6[%c0_10, %c0_11], %11 {strides = array<i32>} : memref<8x128xf32, #tpu.memory_space<vmem>>, vector<8x128xf32>,
    } else {
    }
    %c0 = arith.constant 0 : index
    %c0_1 = arith.constant 0 : index
    %3 = vector.load %arg6[%c0, %c0_1] : memref<8x128xf32, #tpu.memory_space<vmem>>, vector<8x128xf32>
    %c0_2 = arith.constant 0 : index
    %c0_3 = arith.constant 0 : index
    %4 = vector.load %arg3[%c0_2, %c0_3] : memref<8x32xf32, #tpu.memory_space<vmem>>, vector<8x32xf32>
    %c0_4 = arith.constant 0 : index
    %c0_5 = arith.constant 0 : index
    %5 = vector.load %arg4[%c0_4, %c0_5] : memref<32x128xf32, #tpu.memory_space<vmem>>, vector<32x128xf32>
    %cst = arith.constant dense<0.000000e+00> : vector<8x128xf32>
    %6 = tpu.matmul %4, %5, %cst {dimension_numbers = #tpu.dot_dimension_numbers<[1], [0], [0], [1], [0, 0, 1, 1], [], []>} : vector<8x32xf32>, vector<32x128xf32>, vector<8x128xf32> -> vector<8x128xf32>
    %7 = arith.addf %3, %6 : vector<8x128xf32>
    %c0_6 = arith.constant 0 : index
    %c0_7 = arith.constant 0 : index
    %8 = vector.load %arg6[%c0_6, %c0_7] : memref<8x128xf32, #tpu.memory_space<vmem>>, vector<8x128xf32>
    tpu.vector_store %arg6[%c0_6, %c0_7], %7 {strides = array<i32>} : memref<8x128xf32, #tpu.memory_space<vmem>>, vector<8x128xf32>,
    return
  }
  func.func @transform_0(%arg0: i32, %arg1: i32, %arg2: i32) -> (i32, i32) {
    %c0_i32 = arith.constant 0 : i32
    return %arg0, %arg2 : i32, i32
  }
  func.func @transform_1(%arg0: i32, %arg1: i32, %arg2: i32) -> (i32, i32) {
    %c0_i32 = arith.constant 0 : i32
    return %arg2, %arg1 : i32, i32
  }
  func.func @transform_2(%arg0: i32, %arg1: i32, %arg2: i32) -> (i32, i32) {
    %c0_i32 = arith.constant 0 : i32
    %c0_i32_0 = arith.constant 0 : i32
    return %c0_i32, %arg1 : i32, i32
  }
  func.func @transform_3(%arg0: i32, %arg1: i32, %arg2: i32) -> (i32, i32) {
    %c0_i32 = arith.constant 0 : i32
    return %arg0, %arg1 : i32, i32
  }
}

</mosaic_0001>

<bundles_post_ra>
// kernel: tpu_custom_call.1
= control target key start
LH: loop header
LB: loop body
LE: loop exit
PB: predicated region body
PF: predicated region fallthrough
CT: control target
= control target key end

     0   :  { %8 = vsyncpa [#allocation3], 0  ;;  %s281_s0 = inlined_call_operand.hbm [shape: f32[8,32], index: 0, kind: input, shape index: {}]   ;;  %s282_s1 = inlined_call_operand.hbm [shape: f32[32,128], index: 1, kind: input, shape index: {}]   ;;  %s283_s2 = inlined_call_operand.vmem [shape: f32[1,128], index: 2, kind: input, shape index: {}]   ;;  %s284_s3 = inlined_call_operand.hbm [shape: f32[8,128], index: 3, kind: output, shape index: {}]  }
   0x1   :  { %9 = vsyncpa [#allocation6], 0 }
   0x2   :  { %10 = vsyncpa [#allocation4], 0  ;;  %s242_s12 = smov [#allocation2]   ;;  %s243_s14 = smov [#allocation5]  }
   0x3   :  { %s17_s13 = sshll.u32 %s242_s12, 4  ;;  %s26_s15 = sshll.u32 %s243_s14, 4  ;;  %s18_s13 = int_to_ptr.vmem [resolvable:$true] %s17_s13  ;;  %s27_s15 = int_to_ptr.vmem [resolvable:$true] %s26_s15 }
   0x4   :  { %s184_s16 = scalar_lea.vmem %s18_s13, 128  ;;  %p189_p1 = scmp.lt.s32.totalorder %s18_s13, %s18_s13 }
   0x5   :  { %p185_p0 = scmp.ne.s32.totalorder %s18_s13, %s184_s16  ;;  %p190_p2 = scmp.lt.s32.totalorder %s184_s16, %s184_s16 }
   0x7   :  { %p191_p3 = por %p190_p2, %p189_p1 }
   0x9   :  { %p192_p4 = pnand %p191_p3, %p185_p0 }
   0xb   :  { %195 = shalt.err (!%p192_p4)
}
   0xc   :  { %20 = dma.hbm_to_vmem [thread:$0]  %s281_s0, 128, %s18_s13, [#allocation3]  }
   0xd   :  { %s204_s19 = scalar_lea.vmem %s27_s15, 512  ;;  %p209_p6 = scmp.lt.s32.totalorder %s27_s15, %s27_s15 }
   0xe   :  { %p205_p5 = scmp.ne.s32.totalorder %s27_s15, %s204_s19  ;;  %p210_p7 = scmp.lt.s32.totalorder %s204_s19, %s204_s19 }
  0x10   :  { %p211_p8 = por %p210_p7, %p209_p6 }
  0x12   :  { %p212_p9 = pnand %p211_p8, %p205_p5 }
  0x14   :  { %215 = shalt.err (!%p212_p9)
}
  0x15   :  { %s244_s20 = smov 128   ;;  %s245_s21 = smov 8  }
  0x16   :  { %32 = dma.hbm_to_vmem [thread:$0]  %s282_s1, 512, %s27_s15, [#allocation6], %s244_s20, %s244_s20, %s245_s21  }
  0x17   :  { %236 = dma.done.wait [#allocation3], 128  }
  0x18   :  { %237 = vsyncadd [#allocation3], 4294967168 }
  0x19   :  { %238 = dma.done.wait [#allocation6], 512  }
  0x1a   :  { %239 = vsyncadd [#allocation6], 4294966784  ;;  %v246_v0 = vmov 0.0   ;;  %vm247_vm0 = vmmov 0   ;;  %v58_v1 = vld [vmem:[#allocation5 + $0x18] sm:$0xff]  ;;  %v57_v2 = vld [vmem:[#allocation5 + $0x10] sm:$0xff] }
  0x1b   :  { %158 = vmatprep.subr.mxu0 %v246_v0  ;;  %166 = vmatprep.mubr.msk.f32.mxu0 %vm247_vm0, %v246_v0  ;;  %v56_v3 = vld [vmem:[#allocation5 + $0x8] sm:$0xff]  ;;  %v55_v4 = vld [vmem:[#allocation5] sm:$0xff]  ;;  %v54_v5 = vld [vmem:[#allocation2] sm:$0xff]  ;;  %vm59_vm1 = vcmask 261120   ;;  %s248_s24 = smov [#allocation7]  }
  0x1c   :  { %159 = vmatpush3.msra.mxu0 %v58_v1  ;;  %v151_v6 = vld [vmem:[%s283_s2] ss:$0 sm:$0xff]  ;;  %s141_s25 = sshll.u32 %s248_s24, 4  ;;  %s142_s25 = int_to_ptr.vmem [resolvable:$true] %s141_s25 }
  0x1d   :  { %160 = vmatprep.subr.mxu0 %v246_v0  ;;  %s216_s26 = scalar_lea.vmem %s142_s25, 128  ;;  %p221_p11 = scmp.lt.s32.totalorder %s142_s25, %s142_s25 }
  0x1e   :  { %161 = vmatpush3.msra.mxu0 %v57_v2  ;;  %p217_p10 = scmp.ne.s32.totalorder %s142_s25, %s216_s26  ;;  %p222_p12 = scmp.lt.s32.totalorder %s216_s26, %s216_s26 }
  0x1f   :  { %162 = vmatprep.subr.mxu0 %v246_v0 }
  0x20   :  { %163 = vmatpush3.msra.mxu0 %v56_v3  ;;  %p223_p13 = por %p222_p12, %p221_p11 }
  0x21   :  { %164 = vmatprep.subr.mxu0 %v246_v0 }
  0x22   :  { %165 = vmatpush3.msra.mxu0 %v55_v4  ;;  %p224_p0 = pnand %p223_p13, %p217_p10 }
  0x23   :  { %167 = vmatmul.mubr.msk.f32.vlgmr.msra.gmra.mxu0 %vm59_vm1, %v54_v5 }
  0xe3   :  { %v129_v7 = vpop.f32.mrf.mxu0 }
  0xe4   :  { %v133_v8 = vadd.f32 %v151_v6, %v129_v7 }
  0xe5   :  { %v168_v9 = vpop.f32.mrf.mxu0 }
  0xe6   :  { %134 = vst [vmem:[#allocation7] sm:$0xff] %v133_v8 }
  0xe7   :  { %227 = shalt.err (!%p224_p0)
}
  0xe8   :  { %144 = dma.vmem_to_hbm [thread:$0]  %s142_s25, 128, %s284_s3, [#allocation4]  }
  0xe9   :  { %240 = dma.done.wait [#allocation4], 128  }
  0xea   :  { %241 = vsyncadd [#allocation4], 4294967168 }
  0xeb   :  { %148 = vsyncpa [#allocation3], 1 }
  0xec   :  { %149 = vsyncpa [#allocation6], 1 }
  0xed   :  { %150 = vsyncpa [#allocation4], 1 }

</bundles_post_ra>
